<compile_context>
chip_gen: v5e
topology: v5e:2x2
jax: 0.10.0
libtpu: 0.0.40
codegen_flags: <defaults>
</compile_context>

<pallas_src>
import functools

import jax
import jax.numpy as jnp
from jax.experimental import pallas as pl
from jax.experimental.pallas import tpu as pltpu


# ---------------------------------------------------------------------------
# Kernel
# ---------------------------------------------------------------------------
def _discriminator_kernel(seg_sizes, approx_recip,
                          x_ref, w1_ref, w2_ref, b12_ref, wh_ref, bh_ref,
                          out_ref):
    """One batch-tile of the fused Discriminator forward.

    x_ref  : (TB, IN)            input rows (1x1 conv already folded into w1)
    w1_ref : (IN, H)  w2_ref: (H, H)  wh_ref: (H, C+L+D)   (compute dtype)
    b12_ref: (2, H) f32          bh_ref: (1, C+L+D) f32
    out_ref: (TB, C+L+D) f32     three independent softmaxes, lane-concatenated
    """
    total = sum(seg_sizes)

    # embed: Linear -> Tanh -> Linear -> Tanh  (MXU matmuls, f32 accumulation).
    h = jnp.tanh(jnp.dot(x_ref[...], w1_ref[...],
                         preferred_element_type=jnp.float32) + b12_ref[0:1, :])
    h = jnp.tanh(jnp.dot(h.astype(w2_ref.dtype), w2_ref[...],
                         preferred_element_type=jnp.float32) + b12_ref[1:2, :])

    # All three heads as ONE fused matmul on the lane-concatenated weights.
    logits = jnp.dot(h.astype(wh_ref.dtype), wh_ref[...],
                     preferred_element_type=jnp.float32) + bh_ref[...]

    # Independent softmax per head via lane masks at fixed offsets: data never
    # leaves its lane (no sub-128 slices / concat temporaries).
    lane = jax.lax.broadcasted_iota(jnp.int32, (1, total), 1)
    per_lane_max = jnp.zeros_like(logits)
    masks = []
    off = 0
    for n in seg_sizes:
        mask = (lane >= off) & (lane < off + n)
        masks.append(mask)
        seg_max = jnp.max(jnp.where(mask, logits, -jnp.inf),
                          axis=-1, keepdims=True)
        per_lane_max = jnp.where(mask, seg_max, per_lane_max)
        off += n

    e = jnp.exp(logits - per_lane_max)
    per_lane_den = jnp.zeros_like(logits)
    for mask in masks:
        seg_sum = jnp.sum(jnp.where(mask, e, 0.0), axis=-1, keepdims=True)
        per_lane_den = jnp.where(mask, seg_sum, per_lane_den)

    if approx_recip:
        probs = e * pl.reciprocal(per_lane_den, approx=True)   # EUP slot
    else:
        probs = e / per_lane_den                                # exact parity
    out_ref[...] = probs.astype(out_ref.dtype)


# ---------------------------------------------------------------------------
# Host-side wrapper
# ---------------------------------------------------------------------------
def _round_up(x, m):
    return (x + m - 1) // m * m


def _pick_batch_tile(b):
    """Batch tile: whole batch when small, else a multiple-of-8 divisor."""
    if b <= 512:
        return b                       # single block (== full dim) is legal
    for tb in (1024, 512, 256, 128, 64, 32, 16, 8):
        if b % tb == 0:
            return tb
    return b                           # ragged batch: fall back to one block


def _vmem_limit_bytes(tb, in_dim, hidden, total, cbytes):
    """Scoped-VMEM request: derived from block sizes, clamped to [32, 48] MiB
    (above v5e's 16 MiB default, below v7x's 64 MiB physical per-TC)."""
    def tile(r, c, bw):
        return _round_up(max(r, 1), 8) * _round_up(max(c, 1), 128) * bw
    est = (2 * tile(tb, in_dim, cbytes)                 # data, double-buffered
           + 2 * tile(tb, total, 4)                     # out,  double-buffered
           + 2 * (tile(in_dim, hidden, cbytes) + tile(hidden, hidden, cbytes)
                  + tile(hidden, total, cbytes)
                  + tile(2, hidden, 4) + tile(1, total, 4)))
    return int(min(48 << 20, max(32 << 20, 2 * est)))


def discriminator_forward(data, params, *, flag,
                          compute_dtype=jnp.bfloat16,
                          approx_softmax_recip=True):
    """Returns (channel_probs, label_probs, domain_probs)."""
    channels = params["wc"].shape[1]
    labels = params["wl"].shape[1]
    domains = params["wd"].shape[1]
    seg_sizes = (channels, labels, domains)
    total = channels + labels + domains
    hidden = params["w1"].shape[1]

    # ---- host-side packing / fusion (layout plumbing, runs once under jit) --
    w1 = params["w1"].astype(jnp.float32)
    b1 = params["b1"].astype(jnp.float32)
    if flag:
        b, c, f = data.shape
        assert c == channels
        aw = params["aw"].reshape(channels).astype(jnp.float32)
        ab = params["ab"].reshape(()).astype(jnp.float32)
        # Fold the 1x1 Conv1d (channels -> 1) + squeeze into the first Linear:
        #   (sum_c aw[c] x[:,c,:] + ab) @ W1 + b1
        #     == x.reshape(B, C*F) @ (aw ⊗ W1) + (b1 + ab * sum_f W1)
        w1_eff = (aw[:, None, None] * w1[None, :, :]).reshape(channels * f,
                                                              hidden)
        b1_eff = b1 + ab * jnp.sum(w1, axis=0, keepdims=True)
        x = data.reshape(b, channels * f)
    else:
        b, f = data.shape
        w1_eff, b1_eff = w1, b1
        x = data

    in_dim = x.shape[1]
    cbytes = jnp.dtype(compute_dtype).itemsize

    x = x.astype(compute_dtype)
    w1_eff = w1_eff.astype(compute_dtype)
    w2 = params["w2"].astype(compute_dtype)
    wh = jnp.concatenate([params["wc"], params["wl"], params["wd"]],
                         axis=1).astype(compute_dtype)           # (H, C+L+D)
    b12 = jnp.concatenate([b1_eff, params["b2"].astype(jnp.float32)],
                          axis=0)                                # (2, H)
    bh = jnp.concatenate([params["bc"], params["bl"], params["bd"]],
                         axis=1).astype(jnp.float32)             # (1, C+L+D)

    tb = _pick_batch_tile(b)
    grid = (pl.cdiv(b, tb),)

    const_map = lambda i: (0, 0)
    in_specs = [
        pl.BlockSpec((tb, in_dim), lambda i: (i, 0)),   # data: streamed
        pl.BlockSpec(w1_eff.shape, const_map),          # weights: VMEM-resident
        pl.BlockSpec(w2.shape, const_map),
        pl.BlockSpec(b12.shape, const_map),
        pl.BlockSpec(wh.shape, const_map),
        pl.BlockSpec(bh.shape, const_map),
    ]
    out_spec = pl.BlockSpec((tb, total), lambda i: (i, 0))

    flops = 2 * b * (in_dim * hidden + hidden * hidden + hidden * total) \
        + 8 * b * total
    transcendentals = b * (2 * hidden + total)
    bytes_accessed = int(x.size * cbytes
                         + (w1_eff.size + w2.size + wh.size) * cbytes
                         + (b12.size + bh.size) * 4
                         + b * total * 4)

    out = pl.pallas_call(
        functools.partial(_discriminator_kernel, seg_sizes,
                          approx_softmax_recip),
        grid=grid,
        in_specs=in_specs,
        out_specs=out_spec,
        out_shape=jax.ShapeDtypeStruct((b, total), jnp.float32),
        compiler_params=pltpu.CompilerParams(
            dimension_semantics=("parallel",),
            vmem_limit_bytes=_vmem_limit_bytes(tb, in_dim, hidden, total,
                                               cbytes)),
        cost_estimate=pl.CostEstimate(flops=flops,
                                      transcendentals=transcendentals,
                                      bytes_accessed=bytes_accessed),
    )(x, w1_eff, w2, b12, wh, bh)

    # Split the single lane-dense output slab back into the three heads.
    return (out[:, :channels],
            out[:, channels:channels + labels],
            out[:, channels + labels:])


# ---------------------------------------------------------------------------
# Pure-JAX reference (mirrors the PyTorch module) + parameter init
# ---------------------------------------------------------------------------
def discriminator_reference(data, params, *, flag):
    if flag:
        aw = params["aw"].reshape(1, -1, 1)
        x = jnp.sum(aw * data, axis=1) + params["ab"].reshape(())
    else:
        x = data
    h = jnp.tanh(x @ params["w1"] + params["b1"])
    h = jnp.tanh(h @ params["w2"] + params["b2"])

    def head(w, bias):
        return jax.nn.softmax(h @ w + bias, axis=-1)

    return (head(params["wc"], params["bc"]),
            head(params["wl"], params["bl"]),
            head(params["wd"], params["bd"]))


def init_params(key, in_features, hidden, channels, labels, domains):
    ks = jax.random.split(key, 12)
    s = 0.1

    def w(k, shape):
        return (s * jax.random.normal(k, shape)).astype(jnp.float32)

    return {
        # nn.Conv1d(channels, 1, 1): weight (1, channels, 1) -> stored (1, C)
        "aw": w(ks[0], (1, channels)),
        "ab": w(ks[1], (1, 1)),
        # embed (weights stored (in, out): y = x @ W + b)
        "w1": w(ks[2], (in_features, hidden)), "b1": w(ks[3], (1, hidden)),
        "w2": w(ks[4], (hidden, hidden)),      "b2": w(ks[5], (1, hidden)),
        # heads
        "wc": w(ks[6], (hidden, channels)),    "bc": w(ks[7], (1, channels)),
        "wl": w(ks[8], (hidden, labels)),      "bl": w(ks[9], (1, labels)),
        "wd": w(ks[10], (hidden, domains)),    "bd": w(ks[11], (1, domains)),
    }


if __name__ == "__main__":
    B, C, F, H, L, D = 2, 4, 16, 32, 3, 5

    key = jax.random.PRNGKey(0)
    k_data, k_data2, k_params = jax.random.split(key, 3)
    params = init_params(k_params, in_features=F, hidden=H,
                         channels=C, labels=L, domains=D)

    # flag=True path: (B, C, F) input, conv folded into the first matmul.
    data = jax.random.normal(k_data, (B, C, F), dtype=jnp.float32)
    ch_p, lab_p, dom_p = discriminator_forward(data, params, flag=True)
    jax.block_until_ready((ch_p, lab_p, dom_p))
    assert ch_p.shape == (B, C) and lab_p.shape == (B, L) and dom_p.shape == (B, D)
    rc, rl, rd = discriminator_reference(data, params, flag=True)
    for got, ref in ((ch_p, rc), (lab_p, rl), (dom_p, rd)):
        err = float(jnp.max(jnp.abs(got - ref)))
        assert err < 2.5e-2, f"flag=True (bf16) mismatch: {err}"

    # flag=False path: (B, F) input, full-precision / exact-softmax settings.
    data2 = jax.random.normal(k_data2, (B, F), dtype=jnp.float32)
    ch2, lab2, dom2 = discriminator_forward(
        data2, params, flag=False,
        compute_dtype=jnp.float32, approx_softmax_recip=False)
    jax.block_until_ready((ch2, lab2, dom2))
    assert ch2.shape == (B, C) and lab2.shape == (B, L) and dom2.shape == (B, D)
    rc2, rl2, rd2 = discriminator_reference(data2, params, flag=False)
    for got, ref in ((ch2, rc2), (lab2, rl2), (dom2, rd2)):
        err = float(jnp.max(jnp.abs(got - ref)))
        assert err < 1e-5, f"flag=False (f32) mismatch: {err}"

    print("KERNEL_OK")
</pallas_src>

<mosaic_0001>
module attributes {stable_mosaic.version = 11 : i64} {
  func.func @_discriminator_kernel(%arg0: i32, %arg1: memref<2x64xbf16, #tpu.memory_space<vmem>>, %arg2: memref<64x32xbf16, #tpu.memory_space<vmem>>, %arg3: memref<32x32xbf16, #tpu.memory_space<vmem>>, %arg4: memref<2x32xf32, #tpu.memory_space<vmem>>, %arg5: memref<32x12xbf16, #tpu.memory_space<vmem>>, %arg6: memref<1x12xf32, #tpu.memory_space<vmem>>, %arg7: memref<2x12xf32, #tpu.memory_space<vmem>>) attributes {dimension_semantics = [#tpu.dimension_semantics<parallel>], iteration_bounds = array<i64: 1>, scalar_prefetch = 0 : i64, scratch_operands = 0 : i64, tpu.core_type = #tpu.core_type<tc>, window_params = [{transform_indices = @transform_0, window_bounds = array<i64: 2, 64>}, {pipeline_mode = #tpu.pipeline_mode<synchronous>, transform_indices = @transform_1, window_bounds = array<i64: 64, 32>}, {pipeline_mode = #tpu.pipeline_mode<synchronous>, transform_indices = @transform_2, window_bounds = array<i64: 32, 32>}, {pipeline_mode = #tpu.pipeline_mode<synchronous>, transform_indices = @transform_3, window_bounds = array<i64: 2, 32>}, {pipeline_mode = #tpu.pipeline_mode<synchronous>, transform_indices = @transform_4, window_bounds = array<i64: 32, 12>}, {pipeline_mode = #tpu.pipeline_mode<synchronous>, transform_indices = @transform_5, window_bounds = array<i64: 1, 12>}, {transform_indices = @transform_6, window_bounds = array<i64: 2, 12>}]} {
    %c0 = arith.constant 0 : index
    %c0_0 = arith.constant 0 : index
    %0 = vector.load %arg1[%c0, %c0_0] : memref<2x64xbf16, #tpu.memory_space<vmem>>, vector<2x64xbf16>
    %c0_1 = arith.constant 0 : index
    %c0_2 = arith.constant 0 : index
    %1 = vector.load %arg2[%c0_1, %c0_2] : memref<64x32xbf16, #tpu.memory_space<vmem>>, vector<64x32xbf16>
    %cst = arith.constant dense<0.000000e+00> : vector<2x32xf32>
    %2 = tpu.matmul %0, %1, %cst {dimension_numbers = #tpu.dot_dimension_numbers<[1], [0], [0], [1], [0, 0, 1, 1], [], []>} : vector<2x64xbf16>, vector<64x32xbf16>, vector<2x32xf32> -> vector<2x32xf32>
    %c0_3 = arith.constant 0 : index
    %c0_4 = arith.constant 0 : index
    %3 = vector.load %arg4[%c0_3, %c0_4] : memref<2x32xf32, #tpu.memory_space<vmem>>, vector<1x32xf32>
    %4 = vector.broadcast %3 : vector<1x32xf32> to vector<2x32xf32>
    %5 = arith.addf %2, %4 : vector<2x32xf32>
    %6 = math.tanh %5 : vector<2x32xf32>
    %7 = arith.truncf %6 : vector<2x32xf32> to vector<2x32xbf16>
    %c0_5 = arith.constant 0 : index
    %c0_6 = arith.constant 0 : index
    %8 = vector.load %arg3[%c0_5, %c0_6] : memref<32x32xbf16, #tpu.memory_space<vmem>>, vector<32x32xbf16>
    %cst_7 = arith.constant dense<0.000000e+00> : vector<2x32xf32>
    %9 = tpu.matmul %7, %8, %cst_7 {dimension_numbers = #tpu.dot_dimension_numbers<[1], [0], [0], [1], [0, 0, 1, 1], [], []>} : vector<2x32xbf16>, vector<32x32xbf16>, vector<2x32xf32> -> vector<2x32xf32>
    %c1 = arith.constant 1 : index
    %c0_8 = arith.constant 0 : index
    %10 = vector.load %arg4[%c1, %c0_8] : memref<2x32xf32, #tpu.memory_space<vmem>>, vector<1x32xf32>
    %11 = vector.broadcast %10 : vector<1x32xf32> to vector<2x32xf32>
    %12 = arith.addf %9, %11 : vector<2x32xf32>
    %13 = math.tanh %12 : vector<2x32xf32>
    %14 = arith.truncf %13 : vector<2x32xf32> to vector<2x32xbf16>
    %c0_9 = arith.constant 0 : index
    %c0_10 = arith.constant 0 : index
    %15 = vector.load %arg5[%c0_9, %c0_10] : memref<32x12xbf16, #tpu.memory_space<vmem>>, vector<32x12xbf16>
    %cst_11 = arith.constant dense<0.000000e+00> : vector<2x12xf32>
    %16 = tpu.matmul %14, %15, %cst_11 {dimension_numbers = #tpu.dot_dimension_numbers<[1], [0], [0], [1], [0, 0, 1, 1], [], []>} : vector<2x32xbf16>, vector<32x12xbf16>, vector<2x12xf32> -> vector<2x12xf32>
    %c0_12 = arith.constant 0 : index
    %c0_13 = arith.constant 0 : index
    %17 = vector.load %arg6[%c0_12, %c0_13] : memref<1x12xf32, #tpu.memory_space<vmem>>, vector<1x12xf32>
    %18 = vector.broadcast %17 : vector<1x12xf32> to vector<2x12xf32>
    %19 = arith.addf %16, %18 : vector<2x12xf32>
    %20 = tpu.iota {dimensions = array<i32: 1>} : vector<1x12xi32>
    %cst_14 = arith.constant 0.000000e+00 : f32
    %21 = vector.broadcast %cst_14 : f32 to vector<2x12xf32>
    %c0_i32 = arith.constant 0 : i32
    %22 = vector.broadcast %c0_i32 : i32 to vector<1x12xi32>
    %23 = arith.cmpi sge, %20, %22 : vector<1x12xi32>
    %c4_i32 = arith.constant 4 : i32
    %24 = vector.broadcast %c4_i32 : i32 to vector<1x12xi32>
    %25 = arith.cmpi slt, %20, %24 : vector<1x12xi32>
    %26 = arith.andi %23, %25 : vector<1x12xi1>
    %cst_15 = arith.constant 0xFF800000 : f32
    %27 = vector.shape_cast %26 : vector<1x12xi1> to vector<1x12xi1>
    %28 = vector.broadcast %27 : vector<1x12xi1> to vector<2x12xi1>
    %29 = vector.broadcast %cst_15 : f32 to vector<2x12xf32>
    %30 = arith.select %28, %19, %29 : vector<2x12xi1>, vector<2x12xf32>
    %cst_16 = arith.constant dense<0xFF800000> : vector<2xf32>
    %31 = vector.multi_reduction <maximumf>, %30, %cst_16 [1] : vector<2x12xf32> to vector<2xf32>
    %32 = vector.shape_cast %31 : vector<2xf32> to vector<2x1xf32>
    %33 = vector.shape_cast %26 : vector<1x12xi1> to vector<1x12xi1>
    %34 = vector.broadcast %33 : vector<1x12xi1> to vector<2x12xi1>
    %35 = vector.shape_cast %32 : vector<2x1xf32> to vector<2x1xf32>
    %36 = vector.broadcast %35 : vector<2x1xf32> to vector<2x12xf32>
    %37 = arith.select %34, %36, %21 : vector<2x12xi1>, vector<2x12xf32>
    %c4_i32_17 = arith.constant 4 : i32
    %38 = vector.broadcast %c4_i32_17 : i32 to vector<1x12xi32>
    %39 = arith.cmpi sge, %20, %38 : vector<1x12xi32>
    %c7_i32 = arith.constant 7 : i32
    %40 = vector.broadcast %c7_i32 : i32 to vector<1x12xi32>
    %41 = arith.cmpi slt, %20, %40 : vector<1x12xi32>
    %42 = arith.andi %39, %41 : vector<1x12xi1>
    %cst_18 = arith.constant 0xFF800000 : f32
    %43 = vector.shape_cast %42 : vector<1x12xi1> to vector<1x12xi1>
    %44 = vector.broadcast %43 : vector<1x12xi1> to vector<2x12xi1>
    %45 = vector.broadcast %cst_18 : f32 to vector<2x12xf32>
    %46 = arith.select %44, %19, %45 : vector<2x12xi1>, vector<2x12xf32>
    %cst_19 = arith.constant dense<0xFF800000> : vector<2xf32>
    %47 = vector.multi_reduction <maximumf>, %46, %cst_19 [1] : vector<2x12xf32> to vector<2xf32>
    %48 = vector.shape_cast %47 : vector<2xf32> to vector<2x1xf32>
    %49 = vector.shape_cast %42 : vector<1x12xi1> to vector<1x12xi1>
    %50 = vector.broadcast %49 : vector<1x12xi1> to vector<2x12xi1>
    %51 = vector.shape_cast %48 : vector<2x1xf32> to vector<2x1xf32>
    %52 = vector.broadcast %51 : vector<2x1xf32> to vector<2x12xf32>
    %53 = arith.select %50, %52, %37 : vector<2x12xi1>, vector<2x12xf32>
    %c7_i32_20 = arith.constant 7 : i32
    %54 = vector.broadcast %c7_i32_20 : i32 to vector<1x12xi32>
    %55 = arith.cmpi sge, %20, %54 : vector<1x12xi32>
    %c12_i32 = arith.constant 12 : i32
    %56 = vector.broadcast %c12_i32 : i32 to vector<1x12xi32>
    %57 = arith.cmpi slt, %20, %56 : vector<1x12xi32>
    %58 = arith.andi %55, %57 : vector<1x12xi1>
    %cst_21 = arith.constant 0xFF800000 : f32
    %59 = vector.shape_cast %58 : vector<1x12xi1> to vector<1x12xi1>
    %60 = vector.broadcast %59 : vector<1x12xi1> to vector<2x12xi1>
    %61 = vector.broadcast %cst_21 : f32 to vector<2x12xf32>
    %62 = arith.select %60, %19, %61 : vector<2x12xi1>, vector<2x12xf32>
    %cst_22 = arith.constant dense<0xFF800000> : vector<2xf32>
    %63 = vector.multi_reduction <maximumf>, %62, %cst_22 [1] : vector<2x12xf32> to vector<2xf32>
    %64 = vector.shape_cast %63 : vector<2xf32> to vector<2x1xf32>
    %65 = vector.shape_cast %58 : vector<1x12xi1> to vector<1x12xi1>
    %66 = vector.broadcast %65 : vector<1x12xi1> to vector<2x12xi1>
    %67 = vector.shape_cast %64 : vector<2x1xf32> to vector<2x1xf32>
    %68 = vector.broadcast %67 : vector<2x1xf32> to vector<2x12xf32>
    %69 = arith.select %66, %68, %53 : vector<2x12xi1>, vector<2x12xf32>
    %70 = arith.subf %19, %69 : vector<2x12xf32>
    %71 = math.exp %70 : vector<2x12xf32>
    %cst_23 = arith.constant 0.000000e+00 : f32
    %72 = vector.broadcast %cst_23 : f32 to vector<2x12xf32>
    %cst_24 = arith.constant 0.000000e+00 : f32
    %73 = vector.shape_cast %26 : vector<1x12xi1> to vector<1x12xi1>
    %74 = vector.broadcast %73 : vector<1x12xi1> to vector<2x12xi1>
    %75 = vector.broadcast %cst_24 : f32 to vector<2x12xf32>
    %76 = arith.select %74, %71, %75 : vector<2x12xi1>, vector<2x12xf32>
    %cst_25 = arith.constant dense<0.000000e+00> : vector<2xf32>
    %77 = vector.multi_reduction <add>, %76, %cst_25 [1] : vector<2x12xf32> to vector<2xf32>
    %78 = vector.shape_cast %77 : vector<2xf32> to vector<2x1xf32>
    %79 = vector.shape_cast %26 : vector<1x12xi1> to vector<1x12xi1>
    %80 = vector.broadcast %79 : vector<1x12xi1> to vector<2x12xi1>
    %81 = vector.shape_cast %78 : vector<2x1xf32> to vector<2x1xf32>
    %82 = vector.broadcast %81 : vector<2x1xf32> to vector<2x12xf32>
    %83 = arith.select %80, %82, %72 : vector<2x12xi1>, vector<2x12xf32>
    %cst_26 = arith.constant 0.000000e+00 : f32
    %84 = vector.shape_cast %42 : vector<1x12xi1> to vector<1x12xi1>
    %85 = vector.broadcast %84 : vector<1x12xi1> to vector<2x12xi1>
    %86 = vector.broadcast %cst_26 : f32 to vector<2x12xf32>
    %87 = arith.select %85, %71, %86 : vector<2x12xi1>, vector<2x12xf32>
    %cst_27 = arith.constant dense<0.000000e+00> : vector<2xf32>
    %88 = vector.multi_reduction <add>, %87, %cst_27 [1] : vector<2x12xf32> to vector<2xf32>
    %89 = vector.shape_cast %88 : vector<2xf32> to vector<2x1xf32>
    %90 = vector.shape_cast %42 : vector<1x12xi1> to vector<1x12xi1>
    %91 = vector.broadcast %90 : vector<1x12xi1> to vector<2x12xi1>
    %92 = vector.shape_cast %89 : vector<2x1xf32> to vector<2x1xf32>
    %93 = vector.broadcast %92 : vector<2x1xf32> to vector<2x12xf32>
    %94 = arith.select %91, %93, %83 : vector<2x12xi1>, vector<2x12xf32>
    %cst_28 = arith.constant 0.000000e+00 : f32
    %95 = vector.shape_cast %58 : vector<1x12xi1> to vector<1x12xi1>
    %96 = vector.broadcast %95 : vector<1x12xi1> to vector<2x12xi1>
    %97 = vector.broadcast %cst_28 : f32 to vector<2x12xf32>
    %98 = arith.select %96, %71, %97 : vector<2x12xi1>, vector<2x12xf32>
    %cst_29 = arith.constant dense<0.000000e+00> : vector<2xf32>
    %99 = vector.multi_reduction <add>, %98, %cst_29 [1] : vector<2x12xf32> to vector<2xf32>
    %100 = vector.shape_cast %99 : vector<2xf32> to vector<2x1xf32>
    %101 = vector.shape_cast %58 : vector<1x12xi1> to vector<1x12xi1>
    %102 = vector.broadcast %101 : vector<1x12xi1> to vector<2x12xi1>
    %103 = vector.shape_cast %100 : vector<2x1xf32> to vector<2x1xf32>
    %104 = vector.broadcast %103 : vector<2x1xf32> to vector<2x12xf32>
    %105 = arith.select %102, %104, %94 : vector<2x12xi1>, vector<2x12xf32>
    %106 = tpu.reciprocal %105 {approx = true} : vector<2x12xf32> -> vector<2x12xf32>
    %107 = arith.mulf %71, %106 : vector<2x12xf32>
    %c0_30 = arith.constant 0 : index
    %c0_31 = arith.constant 0 : index
    %108 = vector.load %arg7[%c0_30, %c0_31] : memref<2x12xf32, #tpu.memory_space<vmem>>, vector<2x12xf32>
    tpu.vector_store %arg7[%c0_30, %c0_31], %107 {strides = array<i32>} : memref<2x12xf32, #tpu.memory_space<vmem>>, vector<2x12xf32>,
    return
  }
  func.func @transform_0(%arg0: i32) -> (i32, i32) {
    %c0_i32 = arith.constant 0 : i32
    %c0_i32_0 = arith.constant 0 : i32
    return %arg0, %c0_i32 : i32, i32
  }
  func.func @transform_1(%arg0: i32) -> (i32, i32) {
    %c0_i32 = arith.constant 0 : i32
    %c0_i32_0 = arith.constant 0 : i32
    %c0_i32_1 = arith.constant 0 : i32
    return %c0_i32, %c0_i32_0 : i32, i32
  }
  func.func @transform_2(%arg0: i32) -> (i32, i32) {
    %c0_i32 = arith.constant 0 : i32
    %c0_i32_0 = arith.constant 0 : i32
    %c0_i32_1 = arith.constant 0 : i32
    return %c0_i32, %c0_i32_0 : i32, i32
  }
  func.func @transform_3(%arg0: i32) -> (i32, i32) {
    %c0_i32 = arith.constant 0 : i32
    %c0_i32_0 = arith.constant 0 : i32
    %c0_i32_1 = arith.constant 0 : i32
    return %c0_i32, %c0_i32_0 : i32, i32
  }
  func.func @transform_4(%arg0: i32) -> (i32, i32) {
    %c0_i32 = arith.constant 0 : i32
    %c0_i32_0 = arith.constant 0 : i32
    %c0_i32_1 = arith.constant 0 : i32
    return %c0_i32, %c0_i32_0 : i32, i32
  }
  func.func @transform_5(%arg0: i32) -> (i32, i32) {
    %c0_i32 = arith.constant 0 : i32
    %c0_i32_0 = arith.constant 0 : i32
    %c0_i32_1 = arith.constant 0 : i32
    return %c0_i32, %c0_i32_0 : i32, i32
  }
  func.func @transform_6(%arg0: i32) -> (i32, i32) {
    %c0_i32 = arith.constant 0 : i32
    %c0_i32_0 = arith.constant 0 : i32
    return %arg0, %c0_i32 : i32, i32
  }
}

</mosaic_0001>

<bundles_post_ra>
// kernel: tpu_custom_call.1
= control target key start
LH: loop header
LB: loop body
LE: loop exit
PB: predicated region body
PF: predicated region fallthrough
CT: control target
= control target key end

     0   :  { %s413_s0 = inlined_call_operand.vmem [shape: bf16[2,64], index: 0, kind: input, shape index: {}]   ;;  %s414_s1 = inlined_call_operand.vmem [shape: bf16[64,32], index: 1, kind: input, shape index: {}]   ;;  %s415_s2 = inlined_call_operand.vmem [shape: bf16[32,32], index: 2, kind: input, shape index: {}]   ;;  %s416_s3 = inlined_call_operand.vmem [shape: f32[2,32], index: 3, kind: input, shape index: {}]   ;;  %s417_s4 = inlined_call_operand.vmem [shape: bf16[32,12], index: 4, kind: input, shape index: {}]   ;;  %s418_s5 = inlined_call_operand.vmem [shape: f32[1,12], index: 5, kind: input, shape index: {}]   ;;  %s419_s6 = inlined_call_operand.hbm [shape: f32[2,12], index: 6, kind: output, shape index: {}]  }
   0x1   :  { %v260_v0 = vld [vmem:[%s414_s1 + $0x18] sm:$0xff]  ;;  %v259_v1 = vld [vmem:[%s414_s1 + $0x10] sm:$0xff] }
   0x2   :  { %68 = vmatpush.bf16.msra.mxu0 %v260_v0 }
   0x3   :  { %11 = vsyncpa [#allocation3], 0  ;;  %v258_v2 = vld [vmem:[%s414_s1 + $0x8] sm:$0xff]  ;;  %v257_v3 = vld [vmem:[%s414_s1] sm:$0xff]  ;;  %vm60_vm0 = vcmask 523264   ;;  %vm97_vm1 = vcmask 261120   ;;  %v152_v21 = vlaneseq }
   0x4   :  { %v25_v4 = vld [vmem:[%s413_s0] sm:$0x1]  ;;  %v262_v5 = vld [vmem:[%s415_s2 + $0x8] sm:$0xff]  ;;  %v267_v15 = vld [vmem:[%s416_s3 + $0x1] ss:$0 sm:$0xff]  ;;  %vm160_vm6 = vcmask 91136  }
   0x5   :  { %107 = vmatpush.bf16.msra.mxu1 %v262_v5  ;;  %v261_v6 = vld [vmem:[%s415_s2] sm:$0xff]  ;;  %v264_v13 = vld [vmem:[%s417_s4 + $0x8] sm:$0xff]  ;;  %v153_v22 = vand.u32 127, %v152_v21  ;;  %s213_s19 = sshll.u32 %s419_s6, 4  ;;  %s214_s19 = int_to_ptr.hbm [resolvable:$true] %s213_s19 }
   0x6   :  { %69 = vmatpush.bf16.msra.mxu0 %v259_v1  ;;  %v266_v7 = vld [vmem:[%s416_s3] ss:$0 sm:$0xff]  ;;  %145 = vmatpush.bf16.msra.mxu2 %v264_v13  ;;  %s303_s3 = smov [#allocation2]  }
   0x7   :  { %v263_v14 = vld [vmem:[%s417_s4] sm:$0xff]  ;;  %vm175_vm2 = vcmp.ge.s32.totalorder %v153_v22, 7  ;;  %vm176_vm3 = vcmp.lt.s32.totalorder %v153_v22, 12  ;;  %vm155_vm5 = vcmp.lt.s32.totalorder %v153_v22, 4  ;;  %vm165_vm7 = vcmp.ge.s32.totalorder %v153_v22, 4  ;;  %s211_s4 = sshll.u32 %s303_s3, 4  ;;  %s212_s4 = int_to_ptr.vmem [resolvable:$true] %s211_s4 }
   0x8   :  { %v268_v23 = vld [vmem:[%s418_s5] ss:$0 sm:$0xff]  ;;  %vm375_vm4 = vmand %vm175_vm2, %vm176_vm3  ;;  %vm166_vm8 = vcmp.lt.s32.totalorder %v153_v22, 7 }
   0x9   :  { %108 = vmatpush.bf16.msra.mxu1 %v261_v6  ;;  %vm384_vm9 = vmand %vm165_vm7, %vm166_vm8 }
   0xa   :  { %70 = vmatpush.bf16.msra.mxu0 %v258_v2  ;;  %146 = vmatpush.bf16.msra.mxu2 %v263_v14 }
   0xe   :  { %71 = vmatpush.bf16.msra.mxu0 %v257_v3 }
  0x11   :  { %238 = vmatmul.msk.bf16.vlgmr.msra.gmra.mxu0 %vm60_vm0, %v25_v4 }
  0x8e   :  { %v73_v8 = vpop.f32.mrf.mxu0 }
  0x8f   :  { %v74_v9 = vadd.f32 %v266_v7, %v73_v8 }
  0x91   :  { %269 = vtanh.f32 %v74_v9 }
  0x96   :  { %v75_v10 = vpop.f32.mrf.mxu0 }
  0x97   :  { %v270_v11 = vpop.eup %269 }
  0x98   :  { %v78_v12 = vpack.c.bf16 %v270_v11, %v270_v11 }
  0x9a   :  { %247 = vmatmul.msk.bf16.vlgmr.msra.gmra.mxu1 %vm97_vm1, %v78_v12 }
 0x117   :  { %v110_v16 = vpop.f32.mrf.mxu1 }
 0x118   :  { %v111_v17 = vadd.f32 %v267_v15, %v110_v16 }
 0x11a   :  { %271 = vtanh.f32 %v111_v17 }
 0x11f   :  { %v112_v18 = vpop.f32.mrf.mxu1 }
 0x120   :  { %v272_v19 = vpop.eup %271 }
 0x121   :  { %v115_v20 = vpack.c.bf16 %v272_v19, %v272_v19 }
 0x123   :  { %256 = vmatmul.msk.bf16.vlgmr.msra.gmra.mxu2 %vm97_vm1, %v115_v20 }
 0x1a6   :  { %v148_v24 = vpop.f32.mrf.mxu2 }
 0x1a7   :  { %v149_v26 = vadd.f32 %v268_v23, %v148_v24 }
 0x1a9   :  { %v180_v27 = vsel %vm375_vm4, %v149_v26, -inf  ;;  %v159_v28 = vsel %vm155_vm5, %v149_v26, -inf  ;;  %v170_v33 = vsel %vm384_vm9, %v149_v26, -inf }
 0x1aa   :  { %v181_v29 = vsel %vm160_vm6, %v180_v27, -inf  ;;  %v161_v30 = vsel %vm160_vm6, %v159_v28, -inf  ;;  %v171_v34 = vsel %vm160_vm6, %v170_v33, -inf }
 0x1ab   :  { %182 = vmax.xlane.f32.xlu1 %v181_v29  ;;  %162 = vmax.xlane.f32.xlu0 %v161_v30 }
 0x1ae   :  { %v150_v32 = vpop.f32.mrf.mxu2 }
 0x1b3   :  { %172 = vmax.xlane.f32.xlu0 %v171_v34 }
 0x21e   :  { %v163_v35 = vpop.xlane.xlu0 %162  ;;  %v183_v38 = vpop.xlane.xlu1 %182 }
 0x21f   :  { %v164_v36 = vsel %vm155_vm5, %v163_v35, 0.0 }
 0x226   :  { %v173_v37 = vpop.xlane.xlu0 %172 }
 0x227   :  { %v174_v39 = vsel %vm384_vm9, %v173_v37, %v164_v36 }
 0x228   :  { %v184_v40 = vsel %vm375_vm4, %v183_v38, %v174_v39 }
 0x229   :  { %v185_v41 = vsub.f32 %v149_v26, %v184_v40 }
 0x22b   :  { %v186_v42 = vmul.f32 1.442695, %v185_v41 }
 0x22d   :  { %273 = vpow2.f32 %v186_v42 }
 0x233   :  { %v274_v43 = vpop.eup %273 }
 0x234   :  { %v193_v44 = vsel %vm384_vm9, %v274_v43, 0.0  ;;  %v188_v45 = vsel %vm155_vm5, %v274_v43, 0.0  ;;  %v198_v48 = vsel %vm375_vm4, %v274_v43, 0.0 }
 0x235   :  { %v194_v46 = vsel %vm160_vm6, %v193_v44, 0.0  ;;  %v189_v47 = vsel %vm160_vm6, %v188_v45, 0.0  ;;  %v199_v49 = vsel %vm160_vm6, %v198_v48, 0.0 }
 0x236   :  { %195 = vadd.xlane.f32.xlu2 %v194_v46  ;;  %190 = vadd.xlane.f32.xlu1 %v189_v47 }
 0x23e   :  { %200 = vadd.xlane.f32.xlu2 %v199_v49 }
 0x2a9   :  { %v196_v50 = vpop.xlane.xlu2 %195  ;;  %v191_v51 = vpop.xlane.xlu1 %190 }
 0x2aa   :  { %v192_v52 = vsel %vm155_vm5, %v191_v51, 0.0 }
 0x2ab   :  { %v197_v53 = vsel %vm384_vm9, %v196_v50, %v192_v52 }
 0x2b1   :  { %v201_v54 = vpop.xlane.xlu2 %200 }
 0x2b2   :  { %v202_v55 = vsel %vm375_vm4, %v201_v54, %v197_v53 }
 0x2b3   :  { %275 = vrcp.f32 %v202_v55 }
 0x2b9   :  { %v276_v56 = vpop.eup %275 }
 0x2ba   :  { %v204_v57 = vmul.f32 %v276_v56, %v274_v43 }
 0x2bc   :  { %205 = vst.msk [vmem:[#allocation2] sm:$0x3] %vm160_vm6, %v204_v57 }
 0x2bd   :  { %216 = dma.vmem_to_hbm [thread:$0]  %s212_s4, 32, %s214_s19, [#allocation3]  }
 0x2be   :  { %301 = dma.done.wait [#allocation3], 32  }
 0x2bf   :  { %302 = vsyncadd [#allocation3], 4294967264 }
 0x2c0   :  { %221 = vsyncpa [#allocation3], 1 }

</bundles_post_ra>
